<compile_context>
chip_gen: v5e
topology: v5e:2x2
jax: 0.10.0
libtpu: 0.0.40
codegen_flags: <defaults>
</compile_context>

<pallas_src>
import functools

import jax
import jax.numpy as jnp
from jax import lax
from jax.experimental import pallas as pl
from jax.experimental.pallas import tpu as pltpu


def _contrastive_kernel(o1_ref, o2_ref, label_ref, out_ref, acc_ref,
                        *, margin, total_b, block_rows):
    i = pl.program_id(0)

    @pl.when(i == 0)
    def _init():
        acc_ref[...] = jnp.zeros_like(acc_ref)

    # F.pairwise_distance(x1, x2, p=2, eps=1e-6, keepdim=True)
    #   == norm(x1 - x2 + eps, dim=-1, keepdim=True)
    eps = 1e-6
    o1 = o1_ref[...].astype(jnp.float32)
    o2 = o2_ref[...].astype(jnp.float32)
    diff = o1 - o2 + eps                                        # (TB, D)
    sq_sum = jnp.sum(diff * diff, axis=-1, keepdims=True)       # (TB, 1)
    dist = jnp.sqrt(sq_sum)                                     # (TB, 1)

    label = label_ref[...].astype(jnp.float32)                  # (TB, 1)
    # pos term straight from sq_sum: skips the sqrt->square round trip.
    pos_term = (1.0 - label) * sq_sum
    neg_term = label * jnp.square(jnp.maximum(margin - dist, 0.0))
    per_row = pos_term + neg_term                               # (TB, 1)

    # Mask padded/garbage rows of a partial last tile out of the running sum.
    row_ids = i * block_rows + lax.broadcasted_iota(
        jnp.int32, (block_rows, 1), 0)
    per_row = jnp.where(row_ids < total_b, per_row, 0.0)

    acc_ref[...] += per_row

    @pl.when(i == pl.num_programs(0) - 1)
    def _finalize():
        # Single write of the scalar result (no per-step partial stores);
        # divide by the true batch size, not the padded one.
        out_ref[...] = jnp.sum(acc_ref[...], keepdims=True) * (1.0 / total_b)


def _pick_block_rows(B, D, itemsize):
    # Keep each (TB, D) input tile <= ~4 MiB so 2 inputs x 2 pipeline buffers
    # stays well under the smallest default scoped-VMEM budget (16 MiB on
    # v5e, 32 MiB on v6e/v7x; v7x has only 64 MiB physical VMEM).
    budget = 4 * 1024 * 1024
    tb = budget // max(D * itemsize, 1)
    tb = max(8, min(tb, 1024))
    tb = (tb // 8) * 8                       # f32 sublane multiple
    tb = min(tb, max(8, ((B + 7) // 8) * 8))  # never larger than padded batch
    return tb


def contrastive_loss(output1, output2, label, margin=2.0, block_rows=None):
    B, D = output1.shape
    assert output2.shape == (B, D)
    assert label.shape == (B, 1)

    if block_rows is None:
        block_rows = _pick_block_rows(B, D, output1.dtype.itemsize)
    grid = (pl.cdiv(B, block_rows),)

    kernel = functools.partial(
        _contrastive_kernel, margin=margin, total_b=B, block_rows=block_rows)

    out = pl.pallas_call(
        kernel,
        out_shape=jax.ShapeDtypeStruct((1, 1), jnp.float32),
        grid_spec=pltpu.PrefetchScalarGridSpec(
            num_scalar_prefetch=0,
            grid=grid,
            in_specs=[
                pl.BlockSpec((block_rows, D), lambda i: (i, 0)),
                pl.BlockSpec((block_rows, D), lambda i: (i, 0)),
                pl.BlockSpec((block_rows, 1), lambda i: (i, 0)),
            ],
            out_specs=pl.BlockSpec((1, 1), lambda i: (0, 0)),
            scratch_shapes=[pltpu.VMEM((block_rows, 1), jnp.float32)],
        ),
        # Batch axis carries the accumulator -> reduction axis, "arbitrary".
        compiler_params=pltpu.CompilerParams(
            dimension_semantics=("arbitrary",)),
    )(output1, output2, label)
    return out[0, 0]


def _reference(output1, output2, label, margin=2.0):
    # Pure-JAX reference mirroring the PyTorch module.
    eps = 1e-6
    d = jnp.linalg.norm(output1 - output2 + eps, axis=-1, keepdims=True)
    return jnp.mean((1.0 - label) * d**2
                    + label * jnp.maximum(margin - d, 0.0) ** 2)


if __name__ == "__main__":
    key = jax.random.PRNGKey(0)
    k1, k2, k3 = jax.random.split(key, 3)

    # Small shapes; B=30 with block_rows=8 gives a 4-step pipelined grid and
    # exercises masking of the ragged last tile.
    B, D = 30, 32
    output1 = jax.random.normal(k1, (B, D), dtype=jnp.float32)
    output2 = jax.random.normal(k2, (B, D), dtype=jnp.float32)
    label = jax.random.bernoulli(k3, 0.5, (B, 1)).astype(jnp.float32)

    loss = contrastive_loss(output1, output2, label, margin=2.0, block_rows=8)
    loss = jax.block_until_ready(loss)

    ref = _reference(output1, output2, label, margin=2.0)
    assert jnp.allclose(loss, ref, rtol=1e-5, atol=1e-5), (loss, ref)

    print("KERNEL_OK")
</pallas_src>

<mosaic_0001>
module attributes {stable_mosaic.version = 11 : i64} {
  func.func @_contrastive_kernel(%arg0: i32, %arg1: memref<8x32xf32, #tpu.memory_space<vmem>>, %arg2: memref<8x32xf32, #tpu.memory_space<vmem>>, %arg3: memref<8x1xf32, #tpu.memory_space<vmem>>, %arg4: memref<1x1xf32, #tpu.memory_space<vmem>>, %arg5: memref<8x1xf32, #tpu.memory_space<vmem>>) attributes {dimension_semantics = [#tpu.dimension_semantics<arbitrary>], iteration_bounds = array<i64: 4>, scalar_prefetch = 0 : i64, scratch_operands = 1 : i64, tpu.core_type = #tpu.core_type<tc>, window_params = [{transform_indices = @transform_0, window_bounds = array<i64: 8, 32>}, {transform_indices = @transform_1, window_bounds = array<i64: 8, 32>}, {transform_indices = @transform_2, window_bounds = array<i64: 8, 1>}, {pipeline_mode = #tpu.pipeline_mode<synchronous>, transform_indices = @transform_3, window_bounds = array<i64: 1, 1>}]} {
    %c0_i32 = arith.constant 0 : i32
    %0 = arith.cmpi eq, %arg0, %c0_i32 : i32
    %1 = arith.extui %0 : i1 to i32
    %c0_i32_0 = arith.constant 0 : i32
    %2 = arith.cmpi ne, %1, %c0_i32_0 : i32
    scf.if %2 {
      %cst_16 = arith.constant 0.000000e+00 : f32
      %37 = vector.broadcast %cst_16 : f32 to vector<8x1xf32>
      %c0_17 = arith.constant 0 : index
      %c0_18 = arith.constant 0 : index
      %38 = vector.load %arg5[%c0_17, %c0_18] : memref<8x1xf32, #tpu.memory_space<vmem>>, vector<8x1xf32>
      tpu.vector_store %arg5[%c0_17, %c0_18], %37 {strides = array<i32>} : memref<8x1xf32, #tpu.memory_space<vmem>>, vector<8x1xf32>,
    } else {
    }
    %c0 = arith.constant 0 : index
    %c0_1 = arith.constant 0 : index
    %3 = vector.load %arg1[%c0, %c0_1] : memref<8x32xf32, #tpu.memory_space<vmem>>, vector<8x32xf32>
    %c0_2 = arith.constant 0 : index
    %c0_3 = arith.constant 0 : index
    %4 = vector.load %arg2[%c0_2, %c0_3] : memref<8x32xf32, #tpu.memory_space<vmem>>, vector<8x32xf32>
    %5 = arith.subf %3, %4 : vector<8x32xf32>
    %cst = arith.constant 9.99999997E-7 : f32
    %6 = vector.broadcast %cst : f32 to vector<8x32xf32>
    %7 = arith.addf %5, %6 : vector<8x32xf32>
    %8 = arith.mulf %7, %7 : vector<8x32xf32>
    %cst_4 = arith.constant dense<0.000000e+00> : vector<8xf32>
    %9 = vector.multi_reduction <add>, %8, %cst_4 [1] : vector<8x32xf32> to vector<8xf32>
    %10 = vector.shape_cast %9 : vector<8xf32> to vector<8x1xf32>
    %11 = math.sqrt %10 : vector<8x1xf32>
    %c0_5 = arith.constant 0 : index
    %c0_6 = arith.constant 0 : index
    %12 = vector.load %arg3[%c0_5, %c0_6] : memref<8x1xf32, #tpu.memory_space<vmem>>, vector<8x1xf32>
    %cst_7 = arith.constant 1.000000e+00 : f32
    %13 = vector.broadcast %cst_7 : f32 to vector<8x1xf32>
    %14 = arith.subf %13, %12 : vector<8x1xf32>
    %15 = arith.mulf %14, %10 : vector<8x1xf32>
    %cst_8 = arith.constant 2.000000e+00 : f32
    %16 = vector.broadcast %cst_8 : f32 to vector<8x1xf32>
    %17 = arith.subf %16, %11 : vector<8x1xf32>
    %cst_9 = arith.constant 0.000000e+00 : f32
    %18 = vector.broadcast %cst_9 : f32 to vector<8x1xf32>
    %19 = arith.maximumf %17, %18 : vector<8x1xf32>
    %20 = arith.mulf %19, %19 : vector<8x1xf32>
    %21 = arith.mulf %12, %20 : vector<8x1xf32>
    %22 = arith.addf %15, %21 : vector<8x1xf32>
    %c8_i32 = arith.constant 8 : i32
    %23 = arith.muli %arg0, %c8_i32 : i32
    %24 = tpu.iota {dimensions = array<i32: 0>} : vector<8x1xi32>
    %25 = vector.broadcast %23 : i32 to vector<8x1xi32>
    %26 = arith.addi %25, %24 : vector<8x1xi32>
    %c30_i32 = arith.constant 30 : i32
    %27 = vector.broadcast %c30_i32 : i32 to vector<8x1xi32>
    %28 = arith.cmpi slt, %26, %27 : vector<8x1xi32>
    %cst_10 = arith.constant 0.000000e+00 : f32
    %29 = vector.broadcast %cst_10 : f32 to vector<8x1xf32>
    %30 = arith.select %28, %22, %29 : vector<8x1xi1>, vector<8x1xf32>
    %c0_11 = arith.constant 0 : index
    %c0_12 = arith.constant 0 : index
    %31 = vector.load %arg5[%c0_11, %c0_12] : memref<8x1xf32, #tpu.memory_space<vmem>>, vector<8x1xf32>
    %32 = arith.addf %31, %30 : vector<8x1xf32>
    %c0_13 = arith.constant 0 : index
    %c0_14 = arith.constant 0 : index
    %33 = vector.load %arg5[%c0_13, %c0_14] : memref<8x1xf32, #tpu.memory_space<vmem>>, vector<8x1xf32>
    tpu.vector_store %arg5[%c0_13, %c0_14], %32 {strides = array<i32>} : memref<8x1xf32, #tpu.memory_space<vmem>>, vector<8x1xf32>,
    %c3_i32 = arith.constant 3 : i32
    %34 = arith.cmpi eq, %arg0, %c3_i32 : i32
    %35 = arith.extui %34 : i1 to i32
    %c0_i32_15 = arith.constant 0 : i32
    %36 = arith.cmpi ne, %35, %c0_i32_15 : i32
    scf.if %36 {
      %c0_16 = arith.constant 0 : index
      %c0_17 = arith.constant 0 : index
      %37 = vector.load %arg5[%c0_16, %c0_17] : memref<8x1xf32, #tpu.memory_space<vmem>>, vector<8x1xf32>
      %38 = vector.shape_cast %37 : vector<8x1xf32> to vector<1x8x1xf32>
      %cst_18 = arith.constant dense<0.000000e+00> : vector<1xf32>
      %39 = vector.multi_reduction <add>, %38, %cst_18 [1, 2] : vector<1x8x1xf32> to vector<1xf32>
      %40 = vector.shape_cast %39 : vector<1xf32> to vector<1x1x1xf32>
      %41 = vector.extract %40[0, 0, 0] : f32 from vector<1x1x1xf32>
      %42 = vector.broadcast %41 : f32 to vector<1x1xf32>
      %cst_19 = arith.constant 0.0333333351 : f32
      %43 = vector.broadcast %cst_19 : f32 to vector<1x1xf32>
      %44 = arith.mulf %42, %43 : vector<1x1xf32>
      %c0_20 = arith.constant 0 : index
      %c0_21 = arith.constant 0 : index
      %45 = vector.load %arg4[%c0_20, %c0_21] : memref<1x1xf32, #tpu.memory_space<vmem>>, vector<1x1xf32>
      tpu.vector_store %arg4[%c0_20, %c0_21], %44 {strides = array<i32>} : memref<1x1xf32, #tpu.memory_space<vmem>>, vector<1x1xf32>,
    } else {
    }
    return
  }
  func.func @transform_0(%arg0: i32) -> (i32, i32) {
    %c0_i32 = arith.constant 0 : i32
    %c0_i32_0 = arith.constant 0 : i32
    return %arg0, %c0_i32 : i32, i32
  }
  func.func @transform_1(%arg0: i32) -> (i32, i32) {
    %c0_i32 = arith.constant 0 : i32
    %c0_i32_0 = arith.constant 0 : i32
    return %arg0, %c0_i32 : i32, i32
  }
  func.func @transform_2(%arg0: i32) -> (i32, i32) {
    %c0_i32 = arith.constant 0 : i32
    %c0_i32_0 = arith.constant 0 : i32
    return %arg0, %c0_i32 : i32, i32
  }
  func.func @transform_3(%arg0: i32) -> (i32, i32) {
    %c0_i32 = arith.constant 0 : i32
    %c0_i32_0 = arith.constant 0 : i32
    %c0_i32_1 = arith.constant 0 : i32
    return %c0_i32, %c0_i32_0 : i32, i32
  }
}

</mosaic_0001>

<bundles_post_ra>
// kernel: tpu_custom_call.1
= control target key start
LH: loop header
LB: loop body
LE: loop exit
PB: predicated region body
PF: predicated region fallthrough
CT: control target
= control target key end

     0   :  { %8 = vsyncpa [#allocation4], 0  ;;  %s652_s0 = inlined_call_operand.vmem [shape: f32[30,32], index: 0, kind: input, shape index: {}]   ;;  %s653_s1 = inlined_call_operand.hbm [shape: f32[30,32], index: 1, kind: input, shape index: {}]   ;;  %s654_s2 = inlined_call_operand.vmem [shape: f32[30,1], index: 2, kind: input, shape index: {}]   ;;  %s655_s3 = inlined_call_operand.hbm [shape: f32[1,1], index: 3, kind: output, shape index: {}]  }
   0x1   :  { %10 = vsyncpa [#allocation4 + $0x1], 0 }
   0x2   :  { %11 = vsyncpa [#allocation5], 0  ;;  %s545_s12 = smov 0   ;;  %s547_s13 = smov 0  }
   0x3   :  { %s549_s14 = smov 0   ;;  %s551_s15 = smov 0  }
   0x4 LB: > { %s564_s16 = sadd.s32 4294967295, %s521_s15   ;;  %s567_s17 = sadd.s32 1, %s521_s15   ;;  %s521_s15 = sphi %s551_s15, %s662_s15   ;;  %s517_s14 = sphi %s549_s14, %s661_s14   ;;  %s513_s13 = sphi %s547_s13, %s660_s13   ;;  %s509_s12 = sphi %s545_s12, %s659_s12  }
   0x5   : > { %s47_s18 = ssub.s32 %s521_s15, %s567_s17  ;;  %s50_s19 = sadd.s32 1, %s517_s14 }
   0x6   : > { %p48_p0 = scmp.eq.s32.totalorder %s47_s18, 0  ;;  %p57_p1 = scmp.ne.s32.totalorder %s517_s14, %s513_s13 }
   0x7   : > { %p58_p2 = scmp.eq.s32.totalorder %s521_s15, 0  ;;  %p63_p3 = scmp.ne.s32.totalorder %s513_s13, %s509_s12 }
   0x8   : > { %s577_s20 = scalar_select %p48_p0, %s517_s14, %s50_s19  }
   0x9   : > { %p579_p4 = por %p58_p2, %p57_p1  ;;  %p64_p5 = scmp.eq.s32.totalorder %s564_s16, 0 }
   0xa   : > { %p386_p6 = scmp.lt.s32.totalorder %s521_s15, 4  ;;  %s141_s23 = sand.u32 1, %s517_s14  }
   0xb   : > { %p585_p7 = por %p64_p5, %p63_p3  ;;  %s361_s24 = sshll.u32 %s141_s23, 3 }
   0xc   : > { %s362_s25 = sshll.u32 %s521_s15, 3  ;;  %s145_s29 = scalar_lea.vmem [#allocation3], %s361_s24 }
   0xd   : > { %s149_s28 = scalar_lea.hbm %s653_s1, %s362_s25  ;;  %s153_s30 = sshll.u32 %s145_s29, 4  ;;  %s154_s30 = int_to_ptr.vmem [resolvable:$true] %s153_s30 }
   0xe   : > { %s151_s4 = sshll.u32 %s149_s28, 4  ;;  %p596_p8 = pnand %p386_p6, %p579_p4  ;;  %s152_s4 = int_to_ptr.hbm [resolvable:$true] %s151_s4 }
   0xf   : > { %p363_p9 = scmp.ge.s32.totalorder %s521_s15, 1  ;;  %p165_p10 = scmp.lt.s32.totalorder %s521_s15, 5 }
  0x10   : > { %s142_s6 = scalar_lea.sflag [#allocation4], %s141_s23  ;;  %s425_s7 = sshra.s32 %s152_s4, 4  ;;  %s426_s7 = int_to_ptr.hbm [resolvable:$true] %s425_s7 }
  0x11   : > { %s427_s8 = scalar_lea.hbm %s426_s7, 8  ;;  %p429_p12 = pneg %p596_p8 }
  0x12   : > { %p428_p11 = scmp.ne.s32.totalorder %s426_s7, %s427_s8  ;;  %s432_s11 = scalar_lea.hbm %s653_s1, 32 }
  0x13   : > { %p433_p1 = scmp.lt.s32.totalorder %s426_s7, %s653_s1  ;;  %p434_p2 = scmp.lt.s32.totalorder %s432_s11, %s427_s8 }
  0x14   : > { %p430_p13 = pnand %p429_p12, %p428_p11 }
  0x15   : > { %p435_p3 = por %p434_p2, %p433_p1 }
  0x16   : > { %p431_p0 = pneg %p430_p13 }
  0x18   : > { %p436_p4 = pnand %p435_p3, %p431_p0 }
  0x1a   : > { %439 = shalt.err (!%p436_p4)
}
  0x1b   : > { %385 = dma.hbm_to_vmem [thread:$0]  (!%p596_p8), %s152_s4, 128, %s154_s30, %s142_s6  }
  0x1c   : > { %p166_p5 = pnand %p363_p9, %p165_p10 }
  0x1d   : > { %s171_s19 = sand.u32 (!%p166_p5), 1, %s513_s13  }
  0x1e   : > { %169 = sbr.rel (%p166_p5) target bundleno = 400 (0x190), region = 32  ;;  %s364_s21 = sshll.u32 (!%p166_p5), %s171_s19, 3 }
  0x1f   : > { %s172_s23 = scalar_lea.sflag (!%p166_p5), [#allocation4], %s171_s19  ;;  %s175_s24 = scalar_lea.vmem (!%p166_p5), [#allocation3], %s364_s21 }
  0x23   : > { %500 = dma.done.wait (%p585_p7), %s172_s23, 128  }
  0x24   : > { %502 = vsyncadd (%p585_p7), %s172_s23, 4294967168  ;;  %p202_p6 = scmp.lt.s32.totalorder %s564_s16, 3  ;;  %p367_p8 = scmp.ne.s32.totalorder %s564_s16, 0 }
  0x26   : > { %s203_s25 = scalar_select %p202_p6, %s564_s16, 3 }
  0x27   : > { %213 = sbr.rel (%p367_p8) target bundleno = 46 (0x2e), region = 40 }
  0x28   : > { %s365_s26 = sshll.u32 %s203_s25, 3 }
  0x29   : > { %s205_s28 = scalar_lea.vmem %s652_s0, %s365_s26  ;;  %s629_s4 = scalar_lea.vmem %s654_s2, %s365_s26 }
  0x2c   : > { %vm214_vm0 = vcmask 7168   ;;  %v523_v0 = vmov 0.0  }
  0x2d   : > { %215 = vst.msk [vmem:[#allocation2] sm:$0xff] %vm214_vm0, %v523_v0 }
  0x2e PF: > { %v216_v1 = vld [vmem:[%s205_s28] sm:$0xff]  ;;  %v217_v2 = vld [vmem:[%s175_s24] sm:$0xff]  ;;  %vm221_vm1 = vcmask 261120   ;;  %v246_v14 = vlaneseq  ;;  %s368_s22 = sshll.u32 %s564_s16, 3  ;;  %vm254_vm5 = vcmask 7168   ;;  %p369_p7 = scmp.ne.s32.totalorder %s564_s16, 3 }
  0x2f   : > { %v218_v3 = vsub.f32 %v216_v1, %v217_v2  ;;  %v237_v19 = vld [vmem:[%s629_s4] sm:$0xff]  ;;  %v248_v22 = vstv %s368_s22 }
  0x30   : > { %v247_v20 = vshrl.u32 %v246_v14, 7  ;;  %v238_v23 = vsub.f32 1.0, %v237_v19 }
  0x31   : > { %v219_v4 = vadd.f32 1e-06, %v218_v3 }
  0x32   : > { %v249_v25 = vadd.s32 %v248_v22, %v247_v20 }
  0x33   : > { %v220_v5 = vmul.f32 %v219_v4, %v219_v4 }
  0x34   : > { %vm250_vm4 = vcmp.lt.s32.totalorder %v249_v25, 30  ;;  %v252_v30 = vld [vmem:[#allocation2] sm:$0xff] }
  0x35   : > { %v222_v6 = vsel %vm221_vm1, %v220_v5, 0.0 }
  0x36   : > { %223 = vadd.xlane.f32.xlu0 %v222_v6 }
  0xa9   : > { %v224_v7 = vpop.xlane.xlu0 %223 }
  0xaa   : > { %423 = vrsqrt.f32 %v224_v7  ;;  %vm232_vm2 = vcmp.eq.f32.partialorder %v224_v7, inf  ;;  %v235_v16 = vand.u32 2147483648, %v224_v7  ;;  %vm234_vm3 = vcmp.eq.f32.partialorder %v224_v7, 0.0 }
  0xab   : > { %v239_v27 = vmul.f32 %v238_v23, %v224_v7 }
  0xb0   : > { %v424_v8 = vpop.eup %423 }
  0xb1   : > { %v226_v9 = vmul.f32 %v424_v8, %v224_v7 }
  0xb3   : > { %v227_v10 = vmul.f32 %v424_v8, %v226_v9 }
  0xb5   : > { %v228_v11 = vmul.f32 0.5, %v227_v10 }
  0xb7   : > { %v229_v12 = vsub.f32 1.5, %v228_v11 }
  0xb9   : > { %v230_v13 = vmul.f32 %v424_v8, %v229_v12 }
  0xbb   : > { %v231_v15 = vmul.f32 %v230_v13, %v224_v7 }
  0xbd   : > { %v233_v17 = vsel %vm232_vm2, %v224_v7, %v231_v15 }
  0xbe   : > { %v236_v18 = vsel %vm234_vm3, %v235_v16, %v233_v17 }
  0xbf   : > { %v240_v21 = vsub.f32 2.0, %v236_v18 }
  0xc1   : > { %v241_v24 = vmax.f32 %v240_v21, 0.0 }
  0xc3   : > { %v242_v26 = vmul.f32 %v241_v24, %v241_v24 }
  0xc5   : > { %v243_v28 = vmul.f32 %v242_v26, %v237_v19 }
  0xc7   : > { %v244_v29 = vadd.f32 %v243_v28, %v239_v27 }
  0xc8   : > { %259 = sbr.rel (%p369_p7) target bundleno = 395 (0x18b), region = 44 }
  0xc9   : > { %v251_v31 = vsel %vm250_vm4, %v244_v29, 0.0 }
  0xca   : > { %v253_v32 = vadd.f32 %v252_v30, %v251_v31 }
  0xcc   : > { %255 = vst.msk [vmem:[#allocation2] sm:$0xff] %vm254_vm5, %v253_v32 }
  0xcd   : > { %vm273_vm6 = vcmask 0  }
  0xd3   : > { %v260_v33 = vld [vmem:[#allocation2] sm:$0xff] }
  0xd4   : > { %v261_v34 = vsel %vm254_vm5, %v260_v33, 0.0 }
  0xd5   : > { %262 = vadd.xlane.f32.xlu0 %v261_v34 }
 0x148   : > { %v263_v35 = vpop.xlane.xlu0 %262 }
 0x149   : > { %v264_v36 = vrot.slane %v263_v35, 4 }
 0x14b   : > { %v265_v37 = vadd.f32 %v264_v36, %v263_v35 }
 0x14d   : > { %v266_v38 = vrot.slane %v265_v37, 2 }
 0x14f   : > { %v267_v39 = vadd.f32 %v266_v38, %v265_v37 }
 0x151   : > { %v268_v40 = vrot.slane %v267_v39, 1 }
 0x153   : > { %v269_v41 = vadd.f32 %v268_v40, %v267_v39 }
 0x155   : > { %374 = vpush %v269_v41 }
 0x186   : > { %s375_s5 = spop %374 }
 0x187   : > { %v271_v42 = vstv %s375_s5 }
 0x188   : > { %v272_v43 = vmul.f32 0.033333335, %v271_v42 }
 0x18a   : > { %274 = vst.msk [vmem:[#allocation6] sm:$0x1] %vm273_vm6, %v272_v43 }
 0x18b PF: > { %p387_p9 = scmp.eq.s32.totalorder %s564_s16, 3  ;;  %s524_s6 = smov [#allocation6]  }
 0x18c   : > { %s281_s7 = sshll.u32 %s524_s6, 4  ;;  %s283_s10 = sshll.u32 %s655_s3, 4  ;;  %s282_s7 = int_to_ptr.vmem [resolvable:$true] %s281_s7  ;;  %s284_s10 = int_to_ptr.hbm [resolvable:$true] %s283_s10 }
 0x18d   : > { %379 = dma.vmem_to_hbm [thread:$0]  (%p387_p9), %s282_s7, 16, %s284_s10, [#allocation5]  }
 0x18e   : > { %504 = dma.done.wait (%p387_p9), [#allocation5], 16  }
 0x18f   : > { %506 = vsyncadd (%p387_p9), [#allocation5], 4294967280 }
 0x190 PF: > { %p14_p10 = scmp.ge.s32.totalorder %s567_s17, 6   ;;  %s659_s12 = smov %s513_s13 }
 0x191   : > { %s660_s13 = smov %s517_s14  ;;  %s661_s14 = smov %s577_s20 }
 0x192   : > { %s662_s15 = smov %s567_s17  ;;  %16 = sbr.rel (!%p14_p10) target bundleno = 4 (0x4), region = 83 }
 0x197   :  { %297 = vsyncpa [#allocation4], 1 }
 0x198   :  { %299 = vsyncpa [#allocation4 + $0x1], 1 }
 0x199   :  { %300 = vsyncpa [#allocation5], 1 }
 0x19a   :  { %302 = vsyncpa [#allocation5 + $0x1], 1 }

</bundles_post_ra>
